<compile_context>
chip_gen: v5e
topology: v5e:2x2
jax: 0.10.0
libtpu: 0.0.40
codegen_flags: <defaults>
</compile_context>

<pallas_src>
import jax
import jax.numpy as jnp
from jax.experimental import pallas as pl
from jax.experimental.pallas import tpu as pltpu

HIDDEN = 128


def _round_up(n, m):
    return ((n + m - 1) // m) * m


def critic_kernel(seed_ref, xt_ref, w1_ref, b1_ref, w2_ref, b2_ref,
                  w3_ref, b3_ref, o_ref):
    tile = pl.program_id(0)
    tb = o_ref.shape[-1]                          # batch tile (lanes)

    # |x| in transposed layout: (2, TB), batch along lanes.
    xa = jnp.abs(xt_ref[...].astype(jnp.float32))
    x0 = xa[0:1, :]                               # (1, TB)
    x1 = xa[1:2, :]                               # (1, TB)

    # fc1 (K=2): two broadcast FMAs on the VPU instead of a >98%-zero-padded
    # MXU matmul.  w1 is in PyTorch (out=128, in=2) layout.
    h = w1_ref[:, 0:1] * x0 + w1_ref[:, 1:2] * x1 + b1_ref[...]   # (128, TB)
    h = jnp.maximum(h, 0.0)

    # Dropout p=0.5 (training mode, as in F.dropout default): stateless hash
    # (lowbias32 finalizer) over (row, global batch col, seed) -> keep mask,
    # kept activations scaled by 1/(1-p) = 2.
    # TODO(synk): mask values differ from torch's RNG stream; semantics match.
    rows = jax.lax.broadcasted_iota(jnp.int32, h.shape, 0)
    cols = jax.lax.broadcasted_iota(jnp.int32, h.shape, 1)
    gcol = cols + tile * jnp.int32(tb)            # global batch index
    u = (rows * jnp.int32(0x01000193) + gcol).astype(jnp.uint32)
    u = u ^ (seed_ref[0].astype(jnp.uint32) * jnp.uint32(0x9E3779B9))
    u = u ^ (u >> 16)
    u = u * jnp.uint32(0x7FEB352D)
    u = u ^ (u >> 15)
    u = u * jnp.uint32(0x846CA68B)
    u = u ^ (u >> 16)
    keep = u < jnp.uint32(0x80000000)             # P(keep) = 0.5
    h = jnp.where(keep, h * 2.0, 0.0)

    # fc2: the only real MXU matmul.  PyTorch (out, in) weight layout matches
    # the transposed activations directly: (128,128) @ (128,TB).
    h2 = jnp.dot(w2_ref[...], h, preferred_element_type=jnp.float32) + b2_ref[...]
    h2 = jnp.maximum(h2, 0.0)

    # fc3 (N=1): VPU multiply + XLU sublane reduction -> lane-dense (1, TB).
    y = jnp.sum(w3_ref[...] * h2, axis=0, keepdims=True) + b3_ref[...]
    o_ref[...] = jnp.abs(y)


def critic_forward(x, params, seed=0):
    B = x.shape[0]
    # Batch tile: large enough to amortize per-step overhead (~0.35 us),
    # small enough that the (128, TB) f32 intermediates fit comfortably in
    # v7x's 64 MiB VMEM (TB=2048 -> ~1 MiB per intermediate).
    TB = 2048 if B >= 2048 else _round_up(max(B, 1), 128)
    B_pad = _round_up(B, TB)
    grid = (B_pad // TB,)

    xt = jnp.pad(x.astype(jnp.float32).T, ((0, 0), (0, B_pad - B)))  # (2, B_pad)
    seed_arr = jnp.asarray([seed], dtype=jnp.int32)

    xt_spec = pl.BlockSpec((2, TB), lambda i, seed: (0, i))
    const = lambda i, seed: (0, 0)                # weights stay VMEM-resident
    w_specs = [
        pl.BlockSpec((HIDDEN, 2), const),         # w1  (torch layout: out, in)
        pl.BlockSpec((HIDDEN, 1), const),         # b1
        pl.BlockSpec((HIDDEN, HIDDEN), const),    # w2
        pl.BlockSpec((HIDDEN, 1), const),         # b2
        pl.BlockSpec((HIDDEN, 1), const),         # w3 (stored transposed)
        pl.BlockSpec((1, 1), const),              # b3
    ]
    out_spec = pl.BlockSpec((1, TB), lambda i, seed: (0, i))

    out = pl.pallas_call(
        critic_kernel,
        out_shape=jax.ShapeDtypeStruct((1, B_pad), jnp.float32),
        grid_spec=pltpu.PrefetchScalarGridSpec(
            num_scalar_prefetch=1,
            grid=grid,
            in_specs=[xt_spec] + w_specs,
            out_specs=out_spec,
        ),
        compiler_params=pltpu.CompilerParams(
            dimension_semantics=("parallel",)),
    )(seed_arr, xt,
      params["w1"], params["b1"],
      params["w2"], params["b2"],
      params["w3"], params["b3"])

    return out[0, :B].reshape(B, 1)


def init_params(key):
    # PyTorch nn.Linear default init: U(-1/sqrt(fan_in), 1/sqrt(fan_in))
    # for both weights and biases; weights kept in torch (out, in) layout.
    def linear(k, fan_in, fan_out):
        kw, kb = jax.random.split(k)
        bound = 1.0 / (fan_in ** 0.5)
        w = jax.random.uniform(kw, (fan_out, fan_in), jnp.float32, -bound, bound)
        b = jax.random.uniform(kb, (fan_out, 1), jnp.float32, -bound, bound)
        return w, b

    k1, k2, k3 = jax.random.split(key, 3)
    w1, b1 = linear(k1, 2, HIDDEN)            # (128, 2),   (128, 1)
    w2, b2 = linear(k2, HIDDEN, HIDDEN)       # (128, 128), (128, 1)
    w3, b3 = linear(k3, HIDDEN, 1)            # (1, 128),   (1, 1)
    return dict(w1=w1, b1=b1, w2=w2, b2=b2, w3=w3.T, b3=b3)  # w3 stored (128, 1)


if __name__ == "__main__":
    key = jax.random.PRNGKey(0)
    kp, kx = jax.random.split(key)
    params = init_params(kp)

    B = 8
    x = jax.random.normal(kx, (B, 2), dtype=jnp.float32)

    out = critic_forward(x, params, seed=0)
    out = jax.block_until_ready(out)
    assert out.shape == (B, 1)
    assert bool(jnp.all(out >= 0.0))   # final abs() guarantees non-negative
    print("KERNEL_OK")
</pallas_src>

<mosaic_0001>
module attributes {stable_mosaic.version = 11 : i64} {
  func.func @critic_kernel(%arg0: i32, %arg1: memref<1xi32, #tpu.memory_space<smem>>, %arg2: memref<2x128xf32, #tpu.memory_space<vmem>>, %arg3: memref<128x2xf32, #tpu.memory_space<vmem>>, %arg4: memref<128x1xf32, #tpu.memory_space<vmem>>, %arg5: memref<128x128xf32, #tpu.memory_space<vmem>>, %arg6: memref<128x1xf32, #tpu.memory_space<vmem>>, %arg7: memref<128x1xf32, #tpu.memory_space<vmem>>, %arg8: memref<1x1xf32, #tpu.memory_space<vmem>>, %arg9: memref<1x128xf32, #tpu.memory_space<vmem>>) attributes {dimension_semantics = [#tpu.dimension_semantics<parallel>], iteration_bounds = array<i64: 1>, scalar_prefetch = 1 : i64, scratch_operands = 0 : i64, tpu.core_type = #tpu.core_type<tc>, window_params = [{transform_indices = @transform_0, window_bounds = array<i64: 2, 128>}, {pipeline_mode = #tpu.pipeline_mode<synchronous>, transform_indices = @transform_1, window_bounds = array<i64: 128, 2>}, {pipeline_mode = #tpu.pipeline_mode<synchronous>, transform_indices = @transform_2, window_bounds = array<i64: 128, 1>}, {pipeline_mode = #tpu.pipeline_mode<synchronous>, transform_indices = @transform_3, window_bounds = array<i64: 128, 128>}, {pipeline_mode = #tpu.pipeline_mode<synchronous>, transform_indices = @transform_4, window_bounds = array<i64: 128, 1>}, {pipeline_mode = #tpu.pipeline_mode<synchronous>, transform_indices = @transform_5, window_bounds = array<i64: 128, 1>}, {pipeline_mode = #tpu.pipeline_mode<synchronous>, transform_indices = @transform_6, window_bounds = array<i64: 1, 1>}, {transform_indices = @transform_7, window_bounds = array<i64: 1, 128>}]} {
    %c0 = arith.constant 0 : index
    %c0_0 = arith.constant 0 : index
    %0 = vector.load %arg2[%c0, %c0_0] : memref<2x128xf32, #tpu.memory_space<vmem>>, vector<2x128xf32>
    %1 = math.absf %0 : vector<2x128xf32>
    %2 = vector.extract_strided_slice %1 {offsets = [0, 0], sizes = [1, 128], strides = [1, 1]} : vector<2x128xf32> to vector<1x128xf32>
    %3 = vector.extract_strided_slice %1 {offsets = [1, 0], sizes = [1, 128], strides = [1, 1]} : vector<2x128xf32> to vector<1x128xf32>
    %c0_1 = arith.constant 0 : index
    %c0_2 = arith.constant 0 : index
    %4 = vector.load %arg3[%c0_1, %c0_2] : memref<128x2xf32, #tpu.memory_space<vmem>>, vector<128x1xf32>
    %5 = vector.broadcast %4 : vector<128x1xf32> to vector<128x128xf32>
    %6 = vector.broadcast %2 : vector<1x128xf32> to vector<128x128xf32>
    %7 = arith.mulf %5, %6 : vector<128x128xf32>
    %c0_3 = arith.constant 0 : index
    %c1 = arith.constant 1 : index
    %8 = vector.load %arg3[%c0_3, %c1] : memref<128x2xf32, #tpu.memory_space<vmem>>, vector<128x1xf32>
    %9 = vector.broadcast %8 : vector<128x1xf32> to vector<128x128xf32>
    %10 = vector.broadcast %3 : vector<1x128xf32> to vector<128x128xf32>
    %11 = arith.mulf %9, %10 : vector<128x128xf32>
    %12 = arith.addf %7, %11 : vector<128x128xf32>
    %c0_4 = arith.constant 0 : index
    %c0_5 = arith.constant 0 : index
    %13 = vector.load %arg4[%c0_4, %c0_5] : memref<128x1xf32, #tpu.memory_space<vmem>>, vector<128x1xf32>
    %14 = vector.broadcast %13 : vector<128x1xf32> to vector<128x128xf32>
    %15 = arith.addf %12, %14 : vector<128x128xf32>
    %cst = arith.constant 0.000000e+00 : f32
    %16 = vector.broadcast %cst : f32 to vector<128x128xf32>
    %17 = arith.maximumf %15, %16 : vector<128x128xf32>
    %18 = tpu.iota {dimensions = array<i32: 0>} : vector<128x128xi32>
    %19 = tpu.iota {dimensions = array<i32: 1>} : vector<128x128xi32>
    %c128_i32 = arith.constant 128 : i32
    %20 = arith.muli %arg0, %c128_i32 : i32
    %21 = vector.broadcast %20 : i32 to vector<128x128xi32>
    %22 = arith.addi %19, %21 : vector<128x128xi32>
    %c16777619_i32 = arith.constant 16777619 : i32
    %23 = vector.broadcast %c16777619_i32 : i32 to vector<128x128xi32>
    %24 = arith.muli %18, %23 : vector<128x128xi32>
    %25 = arith.addi %24, %22 : vector<128x128xi32>
    %c0_6 = arith.constant 0 : index
    %26 = memref.load %arg1[%c0_6] : memref<1xi32, #tpu.memory_space<smem>>
    %c-1640531527_i32 = arith.constant -1640531527 : i32
    %27 = arith.muli %26, %c-1640531527_i32 : i32
    %28 = vector.broadcast %27 : i32 to vector<128x128xi32>
    %29 = arith.xori %25, %28 : vector<128x128xi32>
    %c16_i32 = arith.constant 16 : i32
    %30 = vector.broadcast %c16_i32 : i32 to vector<128x128xi32>
    %31 = arith.shrui %29, %30 : vector<128x128xi32>
    %32 = arith.xori %29, %31 : vector<128x128xi32>
    %c2146121005_i32 = arith.constant 2146121005 : i32
    %33 = vector.broadcast %c2146121005_i32 : i32 to vector<128x128xi32>
    %34 = arith.muli %32, %33 : vector<128x128xi32>
    %c15_i32 = arith.constant 15 : i32
    %35 = vector.broadcast %c15_i32 : i32 to vector<128x128xi32>
    %36 = arith.shrui %34, %35 : vector<128x128xi32>
    %37 = arith.xori %34, %36 : vector<128x128xi32>
    %c-2073254261_i32 = arith.constant -2073254261 : i32
    %38 = vector.broadcast %c-2073254261_i32 : i32 to vector<128x128xi32>
    %39 = arith.muli %37, %38 : vector<128x128xi32>
    %c16_i32_7 = arith.constant 16 : i32
    %40 = vector.broadcast %c16_i32_7 : i32 to vector<128x128xi32>
    %41 = arith.shrui %39, %40 : vector<128x128xi32>
    %42 = arith.xori %39, %41 : vector<128x128xi32>
    %c-2147483648_i32 = arith.constant -2147483648 : i32
    %43 = vector.broadcast %c-2147483648_i32 : i32 to vector<128x128xi32>
    %44 = arith.cmpi ult, %42, %43 : vector<128x128xi32>
    %cst_8 = arith.constant 2.000000e+00 : f32
    %45 = vector.broadcast %cst_8 : f32 to vector<128x128xf32>
    %46 = arith.mulf %17, %45 : vector<128x128xf32>
    %cst_9 = arith.constant 0.000000e+00 : f32
    %47 = vector.broadcast %cst_9 : f32 to vector<128x128xf32>
    %48 = arith.select %44, %46, %47 : vector<128x128xi1>, vector<128x128xf32>
    %c0_10 = arith.constant 0 : index
    %c0_11 = arith.constant 0 : index
    %49 = vector.load %arg5[%c0_10, %c0_11] : memref<128x128xf32, #tpu.memory_space<vmem>>, vector<128x128xf32>
    %cst_12 = arith.constant dense<0.000000e+00> : vector<128x128xf32>
    %50 = tpu.matmul %49, %48, %cst_12 {dimension_numbers = #tpu.dot_dimension_numbers<[1], [0], [0], [1], [0, 0, 1, 1], [], []>} : vector<128x128xf32>, vector<128x128xf32>, vector<128x128xf32> -> vector<128x128xf32>
    %c0_13 = arith.constant 0 : index
    %c0_14 = arith.constant 0 : index
    %51 = vector.load %arg6[%c0_13, %c0_14] : memref<128x1xf32, #tpu.memory_space<vmem>>, vector<128x1xf32>
    %52 = vector.broadcast %51 : vector<128x1xf32> to vector<128x128xf32>
    %53 = arith.addf %50, %52 : vector<128x128xf32>
    %cst_15 = arith.constant 0.000000e+00 : f32
    %54 = vector.broadcast %cst_15 : f32 to vector<128x128xf32>
    %55 = arith.maximumf %53, %54 : vector<128x128xf32>
    %c0_16 = arith.constant 0 : index
    %c0_17 = arith.constant 0 : index
    %56 = vector.load %arg7[%c0_16, %c0_17] : memref<128x1xf32, #tpu.memory_space<vmem>>, vector<128x1xf32>
    %57 = vector.broadcast %56 : vector<128x1xf32> to vector<128x128xf32>
    %58 = arith.mulf %57, %55 : vector<128x128xf32>
    %cst_18 = arith.constant dense<0.000000e+00> : vector<128xf32>
    %59 = vector.multi_reduction <add>, %58, %cst_18 [0] : vector<128x128xf32> to vector<128xf32>
    %60 = vector.shape_cast %59 : vector<128xf32> to vector<1x128xf32>
    %c0_19 = arith.constant 0 : index
    %c0_20 = arith.constant 0 : index
    %61 = vector.load %arg8[%c0_19, %c0_20] : memref<1x1xf32, #tpu.memory_space<vmem>>, vector<1x1xf32>
    %62 = vector.broadcast %61 : vector<1x1xf32> to vector<1x128xf32>
    %63 = arith.addf %60, %62 : vector<1x128xf32>
    %64 = math.absf %63 : vector<1x128xf32>
    %c0_21 = arith.constant 0 : index
    %c0_22 = arith.constant 0 : index
    %65 = vector.load %arg9[%c0_21, %c0_22] : memref<1x128xf32, #tpu.memory_space<vmem>>, vector<1x128xf32>
    tpu.vector_store %arg9[%c0_21, %c0_22], %64 {strides = array<i32>} : memref<1x128xf32, #tpu.memory_space<vmem>>, vector<1x128xf32>,
    return
  }
  func.func @transform_0(%arg0: i32, %arg1: memref<1xi32, #tpu.memory_space<smem>>) -> (i32, i32) {
    %c0_i32 = arith.constant 0 : i32
    %c0_i32_0 = arith.constant 0 : i32
    return %c0_i32, %arg0 : i32, i32
  }
  func.func @transform_1(%arg0: i32, %arg1: memref<1xi32, #tpu.memory_space<smem>>) -> (i32, i32) {
    %c0_i32 = arith.constant 0 : i32
    %c0_i32_0 = arith.constant 0 : i32
    %c0_i32_1 = arith.constant 0 : i32
    return %c0_i32, %c0_i32_0 : i32, i32
  }
  func.func @transform_2(%arg0: i32, %arg1: memref<1xi32, #tpu.memory_space<smem>>) -> (i32, i32) {
    %c0_i32 = arith.constant 0 : i32
    %c0_i32_0 = arith.constant 0 : i32
    %c0_i32_1 = arith.constant 0 : i32
    return %c0_i32, %c0_i32_0 : i32, i32
  }
  func.func @transform_3(%arg0: i32, %arg1: memref<1xi32, #tpu.memory_space<smem>>) -> (i32, i32) {
    %c0_i32 = arith.constant 0 : i32
    %c0_i32_0 = arith.constant 0 : i32
    %c0_i32_1 = arith.constant 0 : i32
    return %c0_i32, %c0_i32_0 : i32, i32
  }
  func.func @transform_4(%arg0: i32, %arg1: memref<1xi32, #tpu.memory_space<smem>>) -> (i32, i32) {
    %c0_i32 = arith.constant 0 : i32
    %c0_i32_0 = arith.constant 0 : i32
    %c0_i32_1 = arith.constant 0 : i32
    return %c0_i32, %c0_i32_0 : i32, i32
  }
  func.func @transform_5(%arg0: i32, %arg1: memref<1xi32, #tpu.memory_space<smem>>) -> (i32, i32) {
    %c0_i32 = arith.constant 0 : i32
    %c0_i32_0 = arith.constant 0 : i32
    %c0_i32_1 = arith.constant 0 : i32
    return %c0_i32, %c0_i32_0 : i32, i32
  }
  func.func @transform_6(%arg0: i32, %arg1: memref<1xi32, #tpu.memory_space<smem>>) -> (i32, i32) {
    %c0_i32 = arith.constant 0 : i32
    %c0_i32_0 = arith.constant 0 : i32
    %c0_i32_1 = arith.constant 0 : i32
    return %c0_i32, %c0_i32_0 : i32, i32
  }
  func.func @transform_7(%arg0: i32, %arg1: memref<1xi32, #tpu.memory_space<smem>>) -> (i32, i32) {
    %c0_i32 = arith.constant 0 : i32
    %c0_i32_0 = arith.constant 0 : i32
    return %c0_i32, %arg0 : i32, i32
  }
}

</mosaic_0001>

<bundles_post_ra>
// kernel: tpu_custom_call.1
= control target key start
LH: loop header
LB: loop body
LE: loop exit
PB: predicated region body
PF: predicated region fallthrough
CT: control target
= control target key end

     0   :  { %s1781_s0 = inlined_call_operand.<no memory space> [shape: s32[1], index: 0, kind: input, shape index: {}]   ;;  %s1782_s1 = inlined_call_operand.vmem [shape: f32[2,128], index: 1, kind: input, shape index: {}]   ;;  %s1783_s2 = inlined_call_operand.vmem [shape: f32[128,2], index: 2, kind: input, shape index: {}]   ;;  %s1784_s3 = inlined_call_operand.vmem [shape: f32[128,1], index: 3, kind: input, shape index: {}]   ;;  %s1785_s4 = inlined_call_operand.vmem [shape: f32[128,128], index: 4, kind: input, shape index: {}]   ;;  %s1786_s5 = inlined_call_operand.vmem [shape: f32[128,1], index: 5, kind: input, shape index: {}]   ;;  %s1787_s6 = inlined_call_operand.vmem [shape: f32[128,1], index: 6, kind: input, shape index: {}]   ;;  %s1788_s7 = inlined_call_operand.<no memory space> [shape: f32[1,1], index: 7, kind: input, shape index: {}]   ;;  %s1789_s8 = inlined_call_operand.hbm [shape: f32[1,128], index: 8, kind: output, shape index: {}]  }
   0x1   :  { %v14_v0 = vstv %s1788_s7 }
   0x2   :  { %15 = vst [vmem:[#allocation4] sm:$0x1] %v14_v0 }
   0x3   :  { %v37_v1 = vld [vmem:[%s1783_s2 + $0x20] sm:$0xff]  ;;  %v35_v2 = vld [vmem:[%s1783_s2 + $0x10] sm:$0xff]  ;;  %v1121_v3 = vmov 1   ;;  %v1122_v4 = vmov 0  }
   0x4   :  { %1091 = vset.pattern.permute.xlu0 %v1121_v3  ;;  %1088 = vset.pattern.permute.xlu2 %v1122_v4 }
   0x5   :  { %1087 = vset.pattern.permute.xlu1 %v1122_v4  ;;  %71 = vperm.xlu2 %1088, %v37_v1  }
   0x6   :  { %155 = vperm.xlu0 %1091, %v35_v2   ;;  %61 = vperm.xlu1 %1087, %v35_v2  }
   0x7   :  { %16 = vsyncpa [#allocation6], 0  ;;  %v38_v5 = vld [vmem:[%s1783_s2 + $0x28] sm:$0xff]  ;;  %v40_v6 = vld [vmem:[%s1783_s2 + $0x38] sm:$0xff]  ;;  %v371_v63 = vlaneseq  ;;  %s426_s18 = smul.u32 2654435769, %s1781_s0 }
   0x8   :  { %v36_v7 = vld [vmem:[%s1783_s2 + $0x18] sm:$0xff]  ;;  %v41_v8 = vld [vmem:[%s1783_s2 + $0x40] sm:$0xff]  ;;  %v43_v9 = vld [vmem:[%s1783_s2 + $0x50] sm:$0xff]  ;;  %s995_s15 = sshll.u32 %s1789_s8, 4  ;;  %s996_s15 = int_to_ptr.hbm [resolvable:$true] %s995_s15 }
   0x9   :  { %v44_v10 = vld [vmem:[%s1783_s2 + $0x58] sm:$0xff]  ;;  %v46_v11 = vld [vmem:[%s1783_s2 + $0x68] sm:$0xff]  ;;  %v47_v12 = vld [vmem:[%s1783_s2 + $0x70] sm:$0xff] }
   0xa   :  { %v33_v13 = vld [vmem:[%s1783_s2] sm:$0xff]  ;;  %v34_v14 = vld [vmem:[%s1783_s2 + $0x8] sm:$0xff]  ;;  %v39_v15 = vld [vmem:[%s1783_s2 + $0x30] sm:$0xff] }
   0xb   :  { %v42_v16 = vld [vmem:[%s1783_s2 + $0x48] sm:$0xff]  ;;  %v45_v17 = vld [vmem:[%s1783_s2 + $0x60] sm:$0xff]  ;;  %v48_v18 = vld [vmem:[%s1783_s2 + $0x78] sm:$0xff] }
   0xc   :  { %v243_v19 = vld [vmem:[%s1784_s3] sm:$0xff]  ;;  %v257_v20 = vld [vmem:[%s1784_s3 + $0x70] sm:$0xff]  ;;  %v244_v22 = vld [vmem:[%s1784_s3 + $0x8] sm:$0xff] }
   0xd   :  { %76 = vperm.xlu2 %1088, %v38_v5   ;;  %v245_v21 = vld [vmem:[%s1784_s3 + $0x10] sm:$0xff]  ;;  %v254_v24 = vld [vmem:[%s1784_s3 + $0x58] sm:$0xff]  ;;  %v251_v28 = vld [vmem:[%s1784_s3 + $0x40] sm:$0xff] }
   0xe   :  { %175 = vperm.xlu0 %1091, %v40_v6   ;;  %66 = vperm.xlu1 %1087, %v36_v7   ;;  %v258_v25 = vld [vmem:[%s1784_s3 + $0x78] sm:$0xff]  ;;  %v255_v29 = vld [vmem:[%s1784_s3 + $0x60] sm:$0xff]  ;;  %v256_v30 = vld [vmem:[%s1784_s3 + $0x68] sm:$0xff] }
   0xf   :  { %v246_v26 = vld [vmem:[%s1784_s3 + $0x18] sm:$0xff]  ;;  %v31_v31 = vld [vmem:[%s1782_s1] sm:$0x3]  ;;  %v248_v34 = vld [vmem:[%s1784_s3 + $0x28] sm:$0xff] }
  0x10   :  { %v32_v33 = vand.u32 2147483647, %v31_v31  ;;  %v252_v37 = vld [vmem:[%s1784_s3 + $0x48] sm:$0xff]  ;;  %v253_v38 = vld [vmem:[%s1784_s3 + $0x50] sm:$0xff]  ;;  %v250_v47 = vld [vmem:[%s1784_s3 + $0x38] sm:$0xff] }
  0x11   :  { %v669_v45 = vld [vmem:[%s1786_s5 + $0x8] sm:$0xff]  ;;  %v249_v46 = vld [vmem:[%s1784_s3 + $0x30] sm:$0xff]  ;;  %v672_v51 = vld [vmem:[%s1786_s5 + $0x20] sm:$0xff] }
  0x12   :  { %v1262_v35 = vperm.slane %v32_v33, 0  ;;  %v1264_v36 = vperm.slane %v32_v33, 1  ;;  %v668_v52 = vld [vmem:[%s1786_s5] sm:$0xff]  ;;  %v675_v60 = vld [vmem:[%s1786_s5 + $0x38] sm:$0xff]  ;;  %v670_v62 = vld [vmem:[%s1786_s5 + $0x10] sm:$0xff] }
  0x13   :  { %v247_v53 = vld [vmem:[%s1784_s3 + $0x20] sm:$0xff]  ;;  %v671_v61 = vld [vmem:[%s1786_s5 + $0x18] sm:$0xff] }
  0x15   :  { %91 = vperm.xlu2 %1088, %v41_v8  }
  0x16   :  { %187 = vperm.xlu0 %1091, %v43_v9   ;;  %86 = vperm.xlu1 %1087, %v40_v6  }
  0x1d   :  { %106 = vperm.xlu2 %1088, %v44_v10  }
  0x1e   :  { %199 = vperm.xlu0 %1091, %v46_v11   ;;  %101 = vperm.xlu1 %1087, %v43_v9   ;;  %v678_v9 = vld [vmem:[%s1786_s5 + $0x50] sm:$0xff] }
  0x25   :  { %121 = vperm.xlu2 %1088, %v47_v12  }
  0x26   :  { %1092 = vset.pattern.permute.xlu0 %v1122_v4  ;;  %116 = vperm.xlu1 %1087, %v46_v11   ;;  %v674_v11 = vld [vmem:[%s1786_s5 + $0x30] sm:$0xff] }
  0x27   :  { %51 = vperm.xlu0 %1092, %v33_v13  }
  0x2d   :  { %1090 = vset.pattern.permute.xlu2 %v1121_v3 }
  0x2e   :  { %1089 = vset.pattern.permute.xlu1 %v1121_v3  ;;  %151 = vperm.xlu2 %1090, %v34_v14  }
  0x2f   :  { %56 = vperm.xlu0 %1092, %v34_v14   ;;  %147 = vperm.xlu1 %1089, %v33_v13  }
  0x36   :  { %163 = vperm.xlu2 %1090, %v37_v1  }
  0x37   :  { %81 = vperm.xlu0 %1092, %v39_v15   ;;  %159 = vperm.xlu1 %1089, %v36_v7  }
  0x3e   :  { %171 = vperm.xlu2 %1090, %v39_v15  }
  0x3f   :  { %96 = vperm.xlu0 %1092, %v42_v16   ;;  %167 = vperm.xlu1 %1089, %v38_v5   ;;  %v1315_v5 = vshrl.u32 %v371_v63, 7 }
  0x41   :  { %v387_v13 = vadd.s32 120, %v1315_v5 }
  0x46   :  { %183 = vperm.xlu2 %1090, %v42_v16  }
  0x47   :  { %111 = vperm.xlu0 %1092, %v45_v17   ;;  %179 = vperm.xlu1 %1089, %v41_v8  }
  0x4e   :  { %195 = vperm.xlu2 %1090, %v45_v17  }
  0x4f   :  { %126 = vperm.xlu0 %1092, %v48_v18   ;;  %191 = vperm.xlu1 %1089, %v44_v10  }
  0x56   :  { %207 = vperm.xlu2 %1090, %v48_v18  }
  0x57   :  { %261 = vperm.xlu0 %1092, %v243_v19   ;;  %203 = vperm.xlu1 %1089, %v47_v12   ;;  %v673_v12 = vld [vmem:[%s1786_s5 + $0x28] sm:$0xff]  ;;  %v1336_v19 = vand.u32 127, %v371_v63 }
  0x5e   :  { %1094 = vset.pattern.permute.xlu2 %v1122_v4 }
  0x5f   :  { %331 = vperm.xlu0 %1092, %v257_v20   ;;  %1093 = vset.pattern.permute.xlu1 %v1122_v4  ;;  %v1232_v23 = vpop.permute.xlu2 %71  ;;  %v408_v20 = vmul.u32 16777619, %v387_v13 }
  0x60   :  { %271 = vperm.xlu2 %1094, %v245_v21   ;;  %266 = vperm.xlu1 %1093, %v244_v22   ;;  %v134_v6 = vmul.f32 %v1262_v35, %v1232_v23  ;;  %v681_v22 = vld [vmem:[%s1786_s5 + $0x68] sm:$0xff] }
  0x61   :  { %v677_v23 = vld [vmem:[%s1786_s5 + $0x48] sm:$0xff] }
  0x67   :  { %316 = vperm.xlu0 %1092, %v254_v24   ;;  %v1243_v27 = vpop.permute.xlu2 %76  ;;  %v676_v24 = vld [vmem:[%s1786_s5 + $0x40] sm:$0xff] }
  0x68   :  { %336 = vperm.xlu2 %1094, %v258_v25   ;;  %276 = vperm.xlu1 %1093, %v246_v26   ;;  %v424_v25 = vadd.s32 %v408_v20, %v1336_v19  ;;  %v1353_v26 = vstv %s426_s18 }
  0x6f   :  { %301 = vperm.xlu0 %1092, %v251_v28   ;;  %v1257_v32 = vpop.permute.xlu2 %91  ;;  %v386_v28 = vadd.s32 112, %v1315_v5 }
  0x70   :  { %321 = vperm.xlu2 %1094, %v255_v29   ;;  %326 = vperm.xlu1 %1093, %v256_v30  }
  0x71   :  { %v407_v30 = vmul.u32 16777619, %v386_v28 }
  0x77   :  { %286 = vperm.xlu0 %1092, %v248_v34   ;;  %v1272_v39 = vpop.permute.xlu2 %106 }
  0x78   :  { %v156_v40 = vpop.permute.xlu0 %155  ;;  %v62_v41 = vpop.permute.xlu1 %61  ;;  %306 = vperm.xlu2 %1094, %v252_v37   ;;  %311 = vperm.xlu1 %1093, %v253_v38   ;;  %v443_v37 = vxor.u32 %v1353_v26, %v424_v25 }
  0x79   :  { %v213_v42 = vmul.f32 %v1264_v36, %v156_v40  ;;  %v132_v43 = vmul.f32 %v1262_v35, %v62_v41 }
  0x7b   :  { %v1276_v44 = vadd.f32 %v213_v42, %v132_v43  ;;  %v845_v42 = vld [vmem:[%s1787_s6] sm:$0xff] }
  0x7f   :  { %691 = vperm.xlu0 %1092, %v669_v45   ;;  %v1287_v48 = vpop.permute.xlu2 %121  ;;  %v423_v45 = vadd.s32 %v407_v30, %v1336_v19 }
  0x80   :  { %v176_v49 = vpop.permute.xlu0 %175  ;;  %v1289_v50 = vpop.permute.xlu1 %66  ;;  %291 = vperm.xlu2 %1094, %v249_v46   ;;  %296 = vperm.xlu1 %1093, %v250_v47   ;;  %v680_v46 = vld [vmem:[%s1786_s5 + $0x60] sm:$0xff]  ;;  %v679_v47 = vld [vmem:[%s1786_s5 + $0x58] sm:$0xff] }
  0x81   :  { %v218_v54 = vmul.f32 %v1264_v36, %v176_v49 }
  0x87   :  { %706 = vperm.xlu0 %1092, %v672_v51   ;;  %v459_v51 = vshrl.u32 %v443_v37, 16 }
  0x88   :  { %v188_v55 = vpop.permute.xlu0 %187  ;;  %v87_v56 = vpop.permute.xlu1 %86  ;;  %686 = vperm.xlu2 %1094, %v668_v52   ;;  %281 = vperm.xlu1 %1093, %v247_v53   ;;  %v442_v52 = vxor.u32 %v1353_v26, %v423_v45 }
  0x89   :  { %v137_v57 = vmul.f32 %v1262_v35, %v87_v56  ;;  %v152_v58 = vpop.permute.xlu2 %151  ;;  %v221_v2 = vmul.f32 %v1264_v36, %v188_v55  ;;  %v475_v55 = vxor.u32 %v459_v51, %v443_v37 }
  0x8a   :  { %v212_v29 = vmul.f32 %v1264_v36, %v152_v58  ;;  %v458_v63 = vshrl.u32 %v442_v52, 16 }
  0x8b   :  { %v1302_v59 = vadd.f32 %v218_v54, %v137_v57 }
  0x8f   :  { %721 = vperm.xlu0 %1092, %v675_v60   ;;  %v133_v60 = vmul.f32 %v1262_v35, %v1289_v50  ;;  %v474_v50 = vxor.u32 %v458_v63, %v442_v52 }
  0x90   :  { %v200_v0 = vpop.permute.xlu0 %199  ;;  %v102_v1 = vpop.permute.xlu1 %101  ;;  %701 = vperm.xlu2 %1094, %v671_v61   ;;  %696 = vperm.xlu1 %1093, %v670_v62   ;;  %v848_v62 = vld [vmem:[%s1787_s6 + $0x18] sm:$0xff] }
  0x91   :  { %v140_v3 = vmul.f32 %v1262_v35, %v102_v1  ;;  %v164_v4 = vpop.permute.xlu2 %163  ;;  %v224_v15 = vmul.f32 %v1264_v36, %v200_v0  ;;  %v683_v1 = vld [vmem:[%s1786_s5 + $0x78] sm:$0xff] }
  0x92   :  { %v215_v7 = vmul.f32 %v1264_v36, %v164_v4 }
  0x93   :  { %v1320_v8 = vadd.f32 %v221_v2, %v140_v3  ;;  %v682_v2 = vld [vmem:[%s1786_s5 + $0x70] sm:$0xff]  ;;  %v491_v3 = vmul.u32 2146121005, %v475_v55  ;;  %v381_v55 = vadd.s32 72, %v1315_v5 }
  0x94   :  { %v1325_v10 = vadd.f32 %v215_v7, %v134_v6  ;;  %v385_v6 = vadd.s32 104, %v1315_v5 }
  0x95   :  { %v402_v63 = vmul.u32 16777619, %v381_v55 }
  0x96   :  { %v406_v13 = vmul.u32 16777619, %v385_v6 }
  0x97   :  { %736 = vperm.xlu0 %1092, %v678_v9   ;;  %v418_v6 = vadd.s32 %v402_v63, %v1336_v19 }
  0x98   :  { %v117_v14 = vpop.permute.xlu1 %116  ;;  %716 = vperm.xlu2 %1094, %v674_v11   ;;  %711 = vperm.xlu1 %1093, %v673_v12   ;;  %v507_v11 = vshrl.u32 %v491_v3, 15  ;;  %v422_v20 = vadd.s32 %v406_v13, %v1336_v19 }
  0x99   :  { %v143_v16 = vmul.f32 %v1262_v35, %v117_v14  ;;  %v172_v17 = vpop.permute.xlu2 %171  ;;  %v52_v18 = vpop.permute.xlu0 %51  ;;  %v135_v14 = vmul.f32 %v1262_v35, %v1243_v27  ;;  %v846_v27 = vld [vmem:[%s1787_s6 + $0x8] sm:$0xff] }
  0x9a   :  { %v130_v31 = vmul.f32 %v1262_v35, %v52_v18  ;;  %v217_v56 = vmul.f32 %v1264_v36, %v172_v17  ;;  %v851_v17 = vld [vmem:[%s1787_s6 + $0x30] sm:$0xff]  ;;  %v490_v18 = vmul.u32 2146121005, %v474_v50  ;;  %v380_v50 = vadd.s32 64, %v1315_v5 }
  0x9b   :  { %v1341_v21 = vadd.f32 %v224_v15, %v143_v16  ;;  %v384_v16 = vadd.s32 96, %v1315_v5 }
  0x9d   :  { %v405_v28 = vmul.u32 16777619, %v384_v16 }
  0x9f   :  { %751 = vperm.xlu0 %1092, %v681_v22   ;;  %v383_v22 = vadd.s32 88, %v1315_v5 }
  0xa0   :  { %731 = vperm.xlu2 %1094, %v677_v23   ;;  %726 = vperm.xlu1 %1093, %v676_v24   ;;  %v847_v23 = vld [vmem:[%s1787_s6 + $0x10] sm:$0xff]  ;;  %v523_v24 = vxor.u32 %v507_v11, %v491_v3 }
  0xa1   :  { %v1358_v33 = vpop.permute.xlu2 %183  ;;  %v57_v34 = vpop.permute.xlu0 %56  ;;  %v404_v30 = vmul.u32 16777619, %v383_v22 }
  0xa2   :  { %v131_v38 = vmul.f32 %v1262_v35, %v57_v34  ;;  %v148_v40 = vpop.permute.xlu1 %147  ;;  %v506_v34 = vshrl.u32 %v490_v18, 15 }
  0xa3   :  { %v211_v41 = vmul.f32 %v1264_v36, %v148_v40  ;;  %v420_v37 = vadd.s32 %v404_v30, %v1336_v19 }
  0xa4   :  { %v1366_v43 = vadd.f32 %v212_v29, %v131_v38  ;;  %v441_v29 = vxor.u32 %v1353_v26, %v422_v20  ;;  %v382_v38 = vadd.s32 80, %v1315_v5 }
  0xa5   :  { %v1375_v49 = vadd.f32 %v211_v41, %v130_v31  ;;  %v421_v31 = vadd.s32 %v405_v28, %v1336_v19  ;;  %v539_v41 = vmul.u32 2221713035, %v523_v24  ;;  %v439_v51 = vxor.u32 %v1353_v26, %v420_v37  ;;  %v852_v37 = vld [vmem:[%s1787_s6 + $0x38] sm:$0xff] }
  0xa6   :  { %v403_v52 = vmul.u32 16777619, %v382_v38  ;;  %v379_v28 = vadd.s32 56, %v1315_v5 }
  0xa7   :  { %863 = vperm.xlu0 %1092, %v845_v42   ;;  %v440_v42 = vxor.u32 %v1353_v26, %v421_v31 }
  0xa8   :  { %746 = vperm.xlu2 %1094, %v680_v46   ;;  %741 = vperm.xlu1 %1093, %v679_v47   ;;  %v457_v47 = vshrl.u32 %v441_v29, 16 }
  0xa9   :  { %v1378_v53 = vpop.permute.xlu2 %195  ;;  %v82_v54 = vpop.permute.xlu0 %81 }
  0xaa   :  { %v136_v57 = vmul.f32 %v1262_v35, %v82_v54  ;;  %v160_v58 = vpop.permute.xlu1 %159 }
  0xab   :  { %v214_v61 = vmul.f32 %v1264_v36, %v160_v58  ;;  %v419_v58 = vadd.s32 %v403_v52, %v1336_v19 }
  0xac   :  { %v1388_v0 = vadd.f32 %v217_v56, %v136_v57  ;;  %v854_v56 = vld [vmem:[%s1787_s6 + $0x48] sm:$0xff]  ;;  %v522_v57 = vxor.u32 %v506_v34, %v490_v18  ;;  %v853_v34 = vld [vmem:[%s1787_s6 + $0x40] sm:$0xff] }
  0xad   :  { %v1396_v4 = vadd.f32 %v214_v61, %v133_v60  ;;  %v850_v60 = vld [vmem:[%s1787_s6 + $0x28] sm:$0xff]  ;;  %v849_v61 = vld [vmem:[%s1787_s6 + $0x20] sm:$0xff]  ;;  %v438_v3 = vxor.u32 %v1353_v26, %v419_v58 }
  0xae   :  { %v538_v11 = vmul.u32 2221713035, %v522_v57 }
  0xaf   :  { %878 = vperm.xlu0 %1092, %v848_v62   ;;  %v555_v62 = vshrl.u32 %v539_v41, 16 }
  0xb0   :  { %761 = vperm.xlu2 %1094, %v683_v1   ;;  %756 = vperm.xlu1 %1093, %v682_v2   ;;  %v473_v1 = vxor.u32 %v457_v47, %v441_v29  ;;  %v455_v2 = vshrl.u32 %v439_v51, 16  ;;  %v554_v30 = vshrl.u32 %v538_v11, 16 }
  0xb1   :  { %v208_v7 = vpop.permute.xlu2 %207  ;;  %v1399_v9 = vpop.permute.xlu0 %96 }
  0xb2   :  { %v168_v12 = vpop.permute.xlu1 %167  ;;  %v226_v13 = vmul.f32 %v1264_v36, %v208_v7  ;;  %v489_v20 = vmul.u32 2146121005, %v473_v1  ;;  %v471_v22 = vxor.u32 %v455_v2, %v439_v51  ;;  %v857_v7 = vld [vmem:[%s1787_s6 + $0x60] sm:$0xff]  ;;  %v570_v58 = vxor.u32 %v554_v30, %v538_v11 }
  0xb3   :  { %v216_v15 = vmul.f32 %v1264_v36, %v168_v12  ;;  %v401_v12 = vmul.u32 16777619, %v380_v50 }
  0xb4   :  { %v487_v47 = vmul.u32 2146121005, %v471_v22 }
  0xb5   :  { %v1416_v25 = vadd.f32 %v216_v15, %v135_v14  ;;  %v571_v15 = vxor.u32 %v555_v62, %v539_v41  ;;  %v417_v24 = vadd.s32 %v401_v12, %v1336_v19 }
  0xb6   :  { %v503_v50 = vshrl.u32 %v487_v47, 15 }
  0xb7   :  { %893 = vperm.xlu0 %1092, %v851_v17   ;;  %v1019_v38 = vxor.u32 2147483648, %v571_v15  ;;  %v436_v55 = vxor.u32 %v1353_v26, %v417_v24 }
  0xb8   :  { %873 = vperm.xlu2 %1094, %v847_v23   ;;  %868 = vperm.xlu1 %1093, %v846_v27   ;;  %v454_v23 = vshrl.u32 %v438_v3, 16  ;;  %v437_v27 = vxor.u32 %v1353_v26, %v418_v6 }
  0xb9   :  { %v1422_v40 = vpop.permute.xlu0 %111  ;;  %vm1472_vm0 = vcmp.lt.s32.totalorder %v1019_v38, 0 }
  0xba   :  { %v1425_v45 = vpop.permute.xlu1 %179  ;;  %v272_v46 = vpop.permute.xlu2 %271  ;;  %v1461_v51 = vxor.u32 %v454_v23, %v438_v3  ;;  %v453_v52 = vshrl.u32 %v437_v27, 16 }
  0xbb   :  { %v1429_v54 = vadd.f32 %v272_v46, %v1276_v44  ;;  %v456_v44 = vshrl.u32 %v440_v42, 16  ;;  %v505_v46 = vshrl.u32 %v489_v20, 15 }
  0xbc   :  { %v486_v6 = vmul.u32 2146121005, %v1461_v51  ;;  %v1483_v11 = vxor.u32 %v453_v52, %v437_v27 }
  0xbd   :  { %v472_v16 = vxor.u32 %v456_v44, %v440_v42  ;;  %v1476_v3 = vxor.u32 %v505_v46, %v489_v20  ;;  %v855_v20 = vld [vmem:[%s1787_s6 + $0x50] sm:$0xff] }
  0xbe   :  { %v485_v27 = vmul.u32 2146121005, %v1483_v11 }
  0xbf   :  { %908 = vperm.xlu0 %1092, %v854_v56   ;;  %v488_v41 = vmul.u32 2146121005, %v472_v16  ;;  %v400_v56 = vmul.u32 16777619, %v379_v28  ;;  %v1018_v16 = vxor.u32 2147483648, %v570_v58 }
  0xc0   :  { %888 = vperm.xlu2 %1094, %v850_v60   ;;  %883 = vperm.xlu1 %1093, %v849_v61   ;;  %v1466_v60 = vmul.f32 %v1262_v35, %v1257_v32  ;;  %v139_v61 = vmul.f32 %v1262_v35, %v1399_v9  ;;  %v1481_v32 = vmul.f32 %v1262_v35, %v1272_v39  ;;  %v452_v9 = vshrl.u32 %v436_v55, 16  ;;  %v860_v39 = vld [vmem:[%s1787_s6 + $0x78] sm:$0xff] }
  0xc1   :  { %v127_v14 = vpop.permute.xlu0 %126  ;;  %v504_v63 = vshrl.u32 %v488_v41, 15  ;;  %v416_v12 = vadd.s32 %v400_v56, %v1336_v19  ;;  %vm1524_vm1 = vcmp.lt.s32.totalorder %v1018_v16, 0  ;;  %v501_v58 = vshrl.u32 %v485_v27, 15 }
  0xc2   :  { %v145_v17 = vmul.f32 %v1262_v35, %v127_v14  ;;  %v1447_v18 = vpop.permute.xlu1 %191  ;;  %v337_v31 = vpop.permute.xlu2 %336  ;;  %v220_v14 = vmul.f32 %v1264_v36, %v1358_v33  ;;  %v856_v33 = vld [vmem:[%s1787_s6 + $0x58] sm:$0xff]  ;;  %v1518_v24 = vxor.u32 %v452_v9, %v436_v55 }
  0xc3   :  { %v520_v22 = vxor.u32 %v504_v63, %v488_v41  ;;  %v435_v28 = vxor.u32 %v1353_v26, %v416_v12  ;;  %v222_v56 = vmul.f32 %v1264_v36, %v1447_v18  ;;  %v1549_v16 = vxor.u32 %v501_v58, %v485_v27 }
  0xc4   :  { %v242_v29 = vadd.f32 %v226_v13, %v145_v17  ;;  %v144_v13 = vmul.f32 %v1262_v35, %v1287_v48  ;;  %v223_v17 = vmul.f32 %v1264_v36, %v1378_v53  ;;  %v142_v48 = vmul.f32 %v1262_v35, %v1422_v40 }
  0xc5   :  { %v1512_v23 = vadd.f32 %v220_v14, %v139_v61  ;;  %v537_v53 = vmul.u32 2221713035, %v1476_v3  ;;  %v1515_v35 = vxor.u32 %v503_v50, %v487_v47  ;;  %v502_v40 = vshrl.u32 %v486_v6, 15  ;;  %v859_v3 = vld [vmem:[%s1787_s6 + $0x70] sm:$0xff]  ;;  %v858_v50 = vld [vmem:[%s1787_s6 + $0x68] sm:$0xff] }
  0xc6   :  { %v354_v42 = vadd.f32 %v337_v31, %v242_v29  ;;  %v378_v29 = vadd.s32 48, %v1315_v5  ;;  %v536_v41 = vmul.u32 2221713035, %v520_v22  ;;  %v484_v61 = vmul.u32 2146121005, %v1518_v24 }
  0xc7   :  { %923 = vperm.xlu0 %1092, %v857_v7   ;;  %v219_v7 = vmul.f32 %v1264_v36, %v1425_v45  ;;  %v553_v52 = vshrl.u32 %v537_v53, 16  ;;  %v535_v45 = vmul.u32 2221713035, %v1515_v35  ;;  %v374_v31 = vadd.s32 16, %v1315_v5 }
  0xc8   :  { %v370_v57 = vmax.f32 %v354_v42, 0.0  ;;  %903 = vperm.xlu2 %1094, %v853_v34   ;;  %898 = vperm.xlu1 %1093, %v852_v37   ;;  %v377_v34 = vadd.s32 40, %v1315_v5  ;;  %v239_v37 = vadd.f32 %v223_v17, %v142_v48  ;;  %v451_v42 = vshrl.u32 %v435_v28, 16 }
  0xc9   :  { %v1470_v62 = vpop.permute.xlu0 %261  ;;  %v399_v46 = vmul.u32 16777619, %v378_v29  ;;  %v552_v18 = vshrl.u32 %v536_v41, 16  ;;  %v551_v14 = vshrl.u32 %v535_v45, 16  ;;  %v500_v17 = vshrl.u32 %v484_v61, 15 }
  0xca   :  { %v635_v1 = vmul.f32 2.0, %v370_v57  ;;  %v204_v2 = vpop.permute.xlu1 %203  ;;  %v398_v55 = vmul.u32 16777619, %v377_v34  ;;  %v518_v57 = vxor.u32 %v502_v40, %v486_v6  ;;  %v467_v6 = vxor.u32 %v451_v42, %v435_v28  ;;  %v322_v9 = vpop.permute.xlu2 %321 }
  0xcb   :  { %v225_v15 = vmul.f32 %v1264_v36, %v204_v2  ;;  %v415_v63 = vadd.s32 %v399_v46, %v1336_v19  ;;  %v375_v2 = vadd.s32 24, %v1315_v5  ;;  %v1545_v36 = vadd.f32 %v219_v7, %v1466_v60 }
  0xcc   :  { %1020 = vmatpush.msk.msra.mxu0 %vm1472_vm0, %v635_v1  ;;  %1036 = vmatpush.msk.msra.mxu1 %vm1472_vm0, %v635_v1  ;;  %v414_v11 = vadd.s32 %v398_v55, %v1336_v19  ;;  %v238_v60 = vadd.f32 %v222_v56, %v1481_v32  ;;  %v351_v35 = vadd.f32 %v322_v9, %v239_v37  ;;  %v483_v40 = vmul.u32 2146121005, %v467_v6  ;;  %v978_v55 = vld [vmem:[#allocation4] sm:$0x1] }
  0xcd   :  { %1037 = vmatpush.msk.msra.mxu2 %vm1472_vm0, %v635_v1  ;;  %1038 = vmatpush.msk.msra.mxu3 %vm1472_vm0, %v635_v1  ;;  %v241_v30 = vadd.f32 %v225_v15, %v144_v13  ;;  %v376_v1 = vadd.s32 32, %v1315_v5  ;;  %v569_v13 = vxor.u32 %v553_v52, %v537_v53  ;;  %v434_v15 = vxor.u32 %v1353_v26, %v415_v63 }
  0xce   :  { %v433_v48 = vxor.u32 %v1353_v26, %v414_v11  ;;  %v396_v22 = vmul.u32 16777619, %v375_v2  ;;  %v568_v53 = vxor.u32 %v552_v18, %v536_v41  ;;  %v567_v28 = vxor.u32 %v551_v14, %v535_v45 }
  0xcf   :  { %938 = vperm.xlu0 %1092, %v860_v39   ;;  %v534_v39 = vmul.u32 2221713035, %v518_v57  ;;  %v1017_v24 = vxor.u32 2147483648, %v569_v13  ;;  %v533_v34 = vmul.u32 2221713035, %v1549_v16  ;;  %v516_v37 = vxor.u32 %v500_v17, %v484_v61 }
  0xd0   :  { %918 = vperm.xlu2 %1094, %v856_v33   ;;  %913 = vperm.xlu1 %1093, %v855_v20   ;;  %v450_v33 = vshrl.u32 %v434_v15, 16  ;;  %v397_v20 = vmul.u32 16777619, %v376_v1  ;;  %v449_v27 = vshrl.u32 %v433_v48, 16  ;;  %v367_v52 = vmax.f32 %v351_v35, 0.0 }
  0xd1   :  { %v332_v38 = vpop.permute.xlu0 %331  ;;  %v1016_v56 = vxor.u32 2147483648, %v568_v53  ;;  %v499_v45 = vshrl.u32 %v483_v40, 15  ;;  %v373_v57 = vadd.s32 8, %v1315_v5  ;;  %v1015_v58 = vxor.u32 2147483648, %v567_v28 }
  0xd2   :  { %v353_v47 = vadd.f32 %v332_v38, %v241_v30  ;;  %v1529_v51 = vpop.permute.xlu1 %266  ;;  %v466_v29 = vxor.u32 %v450_v33, %v434_v15  ;;  %v413_v7 = vadd.s32 %v397_v20, %v1336_v19  ;;  %v550_v30 = vshrl.u32 %v534_v39, 16 }
  0xd3   :  { %v465_v38 = vxor.u32 %v449_v27, %v433_v48  ;;  %vm1570_vm2 = vcmp.lt.s32.totalorder %v1017_v24, 0  ;;  %v395_v9 = vmul.u32 16777619, %v374_v31  ;;  %vm1574_vm3 = vcmp.lt.s32.totalorder %v1016_v56, 0 }
  0xd4   :  { %v369_v44 = vmax.f32 %v353_v47, 0.0  ;;  %v482_v42 = vmul.u32 2146121005, %v466_v29  ;;  %v432_v46 = vxor.u32 %v1353_v26, %v413_v7  ;;  %v412_v47 = vadd.s32 %v396_v22, %v1336_v19  ;;  %v307_v22 = vpop.permute.xlu2 %306 }
  0xd5   :  { %v566_v2 = vxor.u32 %v550_v30, %v534_v39  ;;  %v1578_v14 = vxor.u32 %v499_v45, %v483_v40  ;;  %v394_v15 = vmul.u32 16777619, %v373_v57  ;;  %vm1580_vm4 = vcmp.lt.s32.totalorder %v1015_v58, 0 }
  0xd6   :  { %v634_v12 = vmul.f32 2.0, %v369_v44  ;;  %v481_v44 = vmul.u32 2146121005, %v465_v38  ;;  %v448_v63 = vshrl.u32 %v432_v46, 16  ;;  %v431_v61 = vxor.u32 %v1353_v26, %v412_v47 }
  0xd7   :  { %v498_v18 = vshrl.u32 %v482_v42, 15  ;;  %v1014_v53 = vxor.u32 2147483648, %v566_v2  ;;  %v411_v24 = vadd.s32 %v395_v9, %v1336_v19  ;;  %v531_v30 = vmul.u32 2221713035, %v1578_v14 }
  0xd8   :  { %933 = vperm.xlu2 %1094, %v859_v3   ;;  %928 = vperm.xlu1 %1093, %v858_v50   ;;  %v549_v3 = vshrl.u32 %v533_v34, 16  ;;  %v532_v50 = vmul.u32 2221713035, %v516_v37  ;;  %v464_v6 = vxor.u32 %v448_v63, %v432_v46  ;;  %v447_v11 = vshrl.u32 %v431_v61, 16 }
  0xd9   :  { %1021 = vmatpush.msk.msra.mxu0 %vm1524_vm1, %v634_v12  ;;  %1039 = vmatpush.msk.msra.mxu1 %vm1524_vm1, %v634_v12  ;;  %v317_v41 = vpop.permute.xlu0 %316  ;;  %v497_v39 = vshrl.u32 %v481_v44, 15  ;;  %v1586_v40 = vxor.u32 %v498_v18, %v482_v42  ;;  %v430_v37 = vxor.u32 %v1353_v26, %v411_v24  ;;  %v410_v38 = vadd.s32 %v394_v15, %v1336_v19 }
  0xda   :  { %1040 = vmatpush.msk.msra.mxu2 %vm1524_vm1, %v634_v12  ;;  %1041 = vmatpush.msk.msra.mxu3 %vm1524_vm1, %v634_v12  ;;  %v1561_v32 = vpop.permute.xlu1 %276  ;;  %v632_v12 = vmul.f32 2.0, %v367_v52  ;;  %v350_v16 = vadd.f32 %v317_v41, %v238_v60  ;;  %v480_v33 = vmul.u32 2146121005, %v464_v6  ;;  %v463_v20 = vxor.u32 %v447_v11, %v431_v61 }
  0xdb   :  { %v565_v27 = vxor.u32 %v549_v3, %v533_v34  ;;  %v548_v28 = vshrl.u32 %v532_v50, 16  ;;  %v393_v60 = vmul.u32 16777619, %v1315_v5  ;;  %v348_v41 = vadd.f32 %v307_v22, %v1512_v23 }
  0xdc   :  { %v479_v29 = vmul.u32 2146121005, %v463_v20  ;;  %v1593_v34 = vxor.u32 %v497_v39, %v481_v44  ;;  %v496_v47 = vshrl.u32 %v480_v33, 15  ;;  %vm1595_vm5 = vcmp.lt.s32.totalorder %v1014_v53, 0 }
  0xdd   :  { %v446_v5 = vshrl.u32 %v430_v37, 16  ;;  %v429_v52 = vxor.u32 %v1353_v26, %v410_v38  ;;  %v530_v56 = vmul.u32 2221713035, %v1586_v40  ;;  %v409_v57 = vadd.s32 %v393_v60, %v1336_v19 }
  0xde   :  { %v495_v45 = vshrl.u32 %v479_v29, 15  ;;  %v1013_v23 = vxor.u32 2147483648, %v565_v27  ;;  %v547_v58 = vshrl.u32 %v531_v30, 16  ;;  %v364_v61 = vmax.f32 %v348_v41, 0.0 }
  0xdf   :  { %v462_v44 = vxor.u32 %v446_v5, %v430_v37  ;;  %v445_v63 = vshrl.u32 %v429_v52, 16  ;;  %v529_v19 = vmul.u32 2221713035, %v1593_v34  ;;  %v546_v14 = vshrl.u32 %v530_v56, 16 }
  0xe0   :  { %981 = vperm.xlu1 %1093, %v978_v55   ;;  %v564_v55 = vxor.u32 %v548_v28, %v532_v50  ;;  %v1611_v50 = vxor.u32 %v496_v47, %v480_v33  ;;  %v1623_v15 = vxor.u32 %v495_v45, %v479_v29  ;;  %v292_v33 = vpop.permute.xlu2 %291  ;;  %vm1634_vm6 = vcmp.lt.s32.totalorder %v1013_v23, 0 }
  0xe1   :  { %v302_v46 = vpop.permute.xlu0 %301  ;;  %v478_v11 = vmul.u32 2146121005, %v462_v44  ;;  %v461_v9 = vxor.u32 %v445_v63, %v429_v52  ;;  %v629_v24 = vmul.f32 2.0, %v364_v61  ;;  %v562_v40 = vxor.u32 %v546_v14, %v530_v56 }
  0xe2   :  { %v327_v17 = vpop.permute.xlu1 %326  ;;  %v347_v18 = vadd.f32 %v302_v46, %v1545_v36  ;;  %v1012_v1 = vxor.u32 2147483648, %v564_v55  ;;  %v528_v13 = vmul.u32 2221713035, %v1611_v50  ;;  %v527_v29 = vmul.u32 2221713035, %v1623_v15 }
  0xe3   :  { %v352_v35 = vadd.f32 %v327_v17, %v1341_v21  ;;  %v366_v21 = vmax.f32 %v350_v16, 0.0  ;;  %v563_v16 = vxor.u32 %v547_v58, %v531_v30  ;;  %v494_v17 = vshrl.u32 %v478_v11, 15 }
  0xe4   :  { %v477_v39 = vmul.u32 2146121005, %v461_v9  ;;  %v363_v22 = vmax.f32 %v347_v18, 0.0  ;;  %v345_v48 = vadd.f32 %v292_v33, %v1388_v0  ;;  %vm1645_vm7 = vcmp.lt.s32.totalorder %v1012_v1, 0 }
  0xe5   :  { %v368_v7 = vmax.f32 %v352_v35, 0.0  ;;  %v631_v2 = vmul.f32 2.0, %v366_v21  ;;  %v510_v53 = vxor.u32 %v494_v17, %v478_v11  ;;  %v1011_v30 = vxor.u32 2147483648, %v563_v16 }
  0xe6   :  { %v493_v27 = vshrl.u32 %v477_v39, 15  ;;  %v544_v41 = vshrl.u32 %v528_v13, 16  ;;  %v628_v34 = vmul.f32 2.0, %v363_v22  ;;  %v1010_v42 = vxor.u32 2147483648, %v562_v40  ;;  %v657_v40 = vld [vmem:[%s1785_s4 + $0x28] sm:$0xff] }
  0xe7   :  { %v633_v31 = vmul.f32 2.0, %v368_v7  ;;  %v526_v21 = vmul.u32 2221713035, %v510_v53  ;;  %v543_v5 = vshrl.u32 %v527_v29, 16  ;;  %v361_v56 = vmax.f32 %v345_v48, 0.0  ;;  %v656_v53 = vld [vmem:[%s1785_s4 + $0x20] sm:$0xff] }
  0xe8   :  { %v509_v37 = vxor.u32 %v493_v27, %v477_v39  ;;  %vm1667_vm8 = vcmp.lt.s32.totalorder %v1011_v30, 0  ;;  %vm1675_vm9 = vcmp.lt.s32.totalorder %v1010_v42, 0  ;;  %v342_v18 = vadd.f32 %v1561_v32, %v1396_v4  ;;  %v660_v27 = vld [vmem:[%s1785_s4 + $0x40] sm:$0xff]  ;;  %v654_v48 = vld [vmem:[%s1785_s4 + $0x10] sm:$0xff] }
  0xe9   :  { %1022 = vmatpush.msk.msra.mxu0 %vm1570_vm2, %v633_v31  ;;  %1042 = vmatpush.msk.msra.mxu1 %vm1570_vm2, %v633_v31  ;;  %v287_v28 = vpop.permute.xlu0 %286  ;;  %v542_v23 = vshrl.u32 %v526_v21, 16  ;;  %v626_v50 = vmul.f32 2.0, %v361_v56  ;;  %v357_v33 = vmax.f32 %v1429_v54, 0.0  ;;  %v658_v7 = vld [vmem:[%s1785_s4 + $0x30] sm:$0xff] }
  0xea   :  { %1043 = vmatpush.msk.msra.mxu2 %vm1570_vm2, %v633_v31  ;;  %1044 = vmatpush.msk.msra.mxu3 %vm1570_vm2, %v633_v31  ;;  %v312_v3 = vpop.permute.xlu1 %311  ;;  %v344_v47 = vadd.f32 %v287_v28, %v1416_v25  ;;  %v525_v52 = vmul.u32 2221713035, %v509_v37  ;;  %v358_v16 = vmax.f32 %v342_v18, 0.0  ;;  %v653_v28 = vld [vmem:[%s1785_s4 + $0x8] sm:$0xff]  ;;  %v662_v30 = vld [vmem:[%s1785_s4 + $0x50] sm:$0xff] }
  0xeb   :  { %v349_v6 = vadd.f32 %v312_v3, %v1320_v8  ;;  %1023 = vmatpush.msk.msra.mxu0 %vm1574_vm3, %v632_v12  ;;  %1045 = vmatpush.msk.msra.mxu1 %vm1574_vm3, %v632_v12  ;;  %v428_v8 = vxor.u32 %v1353_v26, %v409_v57  ;;  %v545_v26 = vshrl.u32 %v529_v19, 16  ;;  %v560_v57 = vxor.u32 %v544_v41, %v528_v13  ;;  %v666_v37 = vld [vmem:[%s1785_s4 + $0x70] sm:$0xff]  ;;  %v663_v41 = vld [vmem:[%s1785_s4 + $0x58] sm:$0xff] }
  0xec   :  { %1046 = vmatpush.msk.msra.mxu2 %vm1574_vm3, %v632_v12  ;;  %1047 = vmatpush.msk.msra.mxu3 %vm1574_vm3, %v632_v12  ;;  %v360_v44 = vmax.f32 %v344_v47, 0.0  ;;  %v541_v3 = vshrl.u32 %v525_v52, 16  ;;  %v558_v1 = vxor.u32 %v542_v23, %v526_v21  ;;  %v623_v13 = vmul.f32 2.0, %v358_v16  ;;  %v667_v21 = vld [vmem:[%s1785_s4 + $0x78] sm:$0xff] }
  0xed   :  { %v365_v36 = vmax.f32 %v349_v6, 0.0  ;;  %1024 = vmatpush.msk.msra.mxu0 %vm1580_vm4, %v631_v2  ;;  %1048 = vmatpush.msk.msra.mxu1 %vm1580_vm4, %v631_v2  ;;  %v444_v20 = vshrl.u32 %v428_v8, 16  ;;  %v561_v0 = vxor.u32 %v545_v26, %v529_v19  ;;  %v1008_v9 = vxor.u32 2147483648, %v560_v57 }
  0xee   :  { %1049 = vmatpush.msk.msra.mxu2 %vm1580_vm4, %v631_v2  ;;  %1050 = vmatpush.msk.msra.mxu3 %vm1580_vm4, %v631_v2  ;;  %v559_v2 = vxor.u32 %v543_v5, %v527_v29  ;;  %v625_v32 = vmul.f32 2.0, %v360_v44  ;;  %v622_v22 = vmul.f32 2.0, %v357_v33  ;;  %v661_v29 = vld [vmem:[%s1785_s4 + $0x48] sm:$0xff] }
  0xef   :  { %v630_v35 = vmul.f32 2.0, %v365_v36  ;;  %v460_v60 = vxor.u32 %v444_v20, %v428_v8  ;;  %v1009_v45 = vxor.u32 2147483648, %v561_v0  ;;  %v557_v8 = vxor.u32 %v541_v3, %v525_v52  ;;  %v659_v0 = vld [vmem:[%s1785_s4 + $0x38] sm:$0xff] }
  0xf0   :  { %v1007_v15 = vxor.u32 2147483648, %v559_v2  ;;  %v340_v36 = vadd.f32 %v1529_v51, %v1366_v43  ;;  %vm586_vm11 = vcmp.lt.s32.totalorder %v1008_v9, 0  ;;  %v339_v43 = vadd.f32 %v1470_v62, %v1375_v49  ;;  %v652_v62 = vld [vmem:[%s1785_s4] sm:$0xff] }
  0xf1   :  { %1025 = vmatpush.msk.msra.mxu0 %vm1595_vm5, %v630_v35  ;;  %1051 = vmatpush.msk.msra.mxu1 %vm1595_vm5, %v630_v35  ;;  %v476_v46 = vmul.u32 2146121005, %v460_v60  ;;  %vm1689_vm10 = vcmp.lt.s32.totalorder %v1009_v45, 0  ;;  %v1005_v12 = vxor.u32 2147483648, %v557_v8  ;;  %v665_v60 = vld [vmem:[%s1785_s4 + $0x68] sm:$0xff] }
  0xf2   :  { %1052 = vmatpush.msk.msra.mxu2 %vm1595_vm5, %v630_v35  ;;  %1053 = vmatpush.msk.msra.mxu3 %vm1595_vm5, %v630_v35  ;;  %v297_v38 = vpop.permute.xlu1 %296  ;;  %vm583_vm12 = vcmp.lt.s32.totalorder %v1007_v15, 0  ;;  %v356_v26 = vmax.f32 %v340_v36, 0.0  ;;  %v355_v35 = vmax.f32 %v339_v43, 0.0 }
  0xf3   :  { %v346_v31 = vadd.f32 %v297_v38, %v1302_v59  ;;  %1026 = vmatpush.msk.msra.mxu0 %vm1634_vm6, %v629_v24  ;;  %1054 = vmatpush.msk.msra.mxu1 %vm1634_vm6, %v629_v24  ;;  %v492_v55 = vshrl.u32 %v476_v46, 15  ;;  %vm577_vm14 = vcmp.lt.s32.totalorder %v1005_v12, 0  ;;  %v655_v38 = vld [vmem:[%s1785_s4 + $0x18] sm:$0xff] }
  0xf4   :  { %1055 = vmatpush.msk.msra.mxu2 %vm1634_vm6, %v629_v24  ;;  %1056 = vmatpush.msk.msra.mxu3 %vm1634_vm6, %v629_v24  ;;  %v621_v54 = vmul.f32 2.0, %v356_v26  ;;  %v620_v49 = vmul.f32 2.0, %v355_v35  ;;  %v664_v24 = vld [vmem:[%s1785_s4 + $0x60] sm:$0xff]  ;;  %s1123_s4 = smov [#allocation5]  }
  0xf5   :  { %v362_v25 = vmax.f32 %v346_v31, 0.0  ;;  %1027 = vmatpush.msk.msra.mxu0 %vm1645_vm7, %v628_v34  ;;  %1057 = vmatpush.msk.msra.mxu1 %vm1645_vm7, %v628_v34  ;;  %v508_v58 = vxor.u32 %v492_v55, %v476_v46  ;;  %v687_v46 = vpop.permute.xlu2 %686  ;;  %s993_s12 = sshll.u32 %s1123_s4, 4  ;;  %s994_s12 = int_to_ptr.vmem [resolvable:$true] %s993_s12 }
  0xf6   :  { %1058 = vmatpush.msk.msra.mxu2 %vm1645_vm7, %v628_v34  ;;  %1059 = vmatpush.msk.msra.mxu3 %vm1645_vm7, %v628_v34  ;;  %v692_v34 = vpop.permute.xlu0 %691 }
  0xf7   :  { %v627_v63 = vmul.f32 2.0, %v362_v25  ;;  %v524_v19 = vmul.u32 2221713035, %v508_v58 }
  0xf9   :  { %1028 = vmatpush.msk.msra.mxu0 %vm1667_vm8, %v627_v63  ;;  %1060 = vmatpush.msk.msra.mxu1 %vm1667_vm8, %v627_v63  ;;  %v540_v4 = vshrl.u32 %v524_v19, 16 }
  0xfa   :  { %1061 = vmatpush.msk.msra.mxu2 %vm1667_vm8, %v627_v63  ;;  %1062 = vmatpush.msk.msra.mxu3 %vm1667_vm8, %v627_v63  ;;  %v282_v6 = vpop.permute.xlu1 %281 }
  0xfb   :  { %v343_v14 = vadd.f32 %v282_v6, %v1325_v10  ;;  %1029 = vmatpush.msk.msra.mxu0 %vm1675_vm9, %v626_v50  ;;  %1063 = vmatpush.msk.msra.mxu1 %vm1675_vm9, %v626_v50  ;;  %v1006_v10 = vxor.u32 2147483648, %v558_v1  ;;  %v556_v39 = vxor.u32 %v540_v4, %v524_v19 }
  0xfc   :  { %1064 = vmatpush.msk.msra.mxu2 %vm1675_vm9, %v626_v50  ;;  %1065 = vmatpush.msk.msra.mxu3 %vm1675_vm9, %v626_v50 }
  0xfd   :  { %v359_v17 = vmax.f32 %v343_v14, 0.0  ;;  %1030 = vmatpush.msk.msra.mxu0 %vm1689_vm10, %v625_v32  ;;  %1066 = vmatpush.msk.msra.mxu1 %vm1689_vm10, %v625_v32  ;;  %vm580_vm13 = vcmp.lt.s32.totalorder %v1006_v10, 0  ;;  %v1004_v20 = vxor.u32 2147483648, %v556_v39  ;;  %v702_v31 = vpop.permute.xlu2 %701 }
  0xfe   :  { %1067 = vmatpush.msk.msra.mxu2 %vm1689_vm10, %v625_v32  ;;  %1068 = vmatpush.msk.msra.mxu3 %vm1689_vm10, %v625_v32  ;;  %v707_v42 = vpop.permute.xlu0 %706 }
  0xff   :  { %v624_v51 = vmul.f32 2.0, %v359_v17  ;;  %vm574_vm15 = vcmp.lt.s32.totalorder %v1004_v20, 0 }
 0x101   :  { %1031 = vmatpush.msk.msra.mxu0 %vm586_vm11, %v624_v51  ;;  %1069 = vmatpush.msk.msra.mxu1 %vm586_vm11, %v624_v51 }
 0x102   :  { %1070 = vmatpush.msk.msra.mxu2 %vm586_vm11, %v624_v51  ;;  %1071 = vmatpush.msk.msra.mxu3 %vm586_vm11, %v624_v51  ;;  %v697_v47 = vpop.permute.xlu1 %696 }
 0x103   :  { %1032 = vmatpush.msk.msra.mxu0 %vm583_vm12, %v623_v13  ;;  %1072 = vmatpush.msk.msra.mxu1 %vm583_vm12, %v623_v13 }
 0x104   :  { %1073 = vmatpush.msk.msra.mxu2 %vm583_vm12, %v623_v13  ;;  %1074 = vmatpush.msk.msra.mxu3 %vm583_vm12, %v623_v13 }
 0x105   :  { %1033 = vmatpush.msk.msra.mxu0 %vm580_vm13, %v622_v22  ;;  %1075 = vmatpush.msk.msra.mxu1 %vm580_vm13, %v622_v22  ;;  %v717_v52 = vpop.permute.xlu2 %716 }
 0x106   :  { %1076 = vmatpush.msk.msra.mxu2 %vm580_vm13, %v622_v22  ;;  %1077 = vmatpush.msk.msra.mxu3 %vm580_vm13, %v622_v22  ;;  %v722_v55 = vpop.permute.xlu0 %721 }
 0x107   :  { %1034 = vmatpush.msk.msra.mxu0 %vm577_vm14, %v621_v54  ;;  %1078 = vmatpush.msk.msra.mxu1 %vm577_vm14, %v621_v54 }
 0x108   :  { %1079 = vmatpush.msk.msra.mxu2 %vm577_vm14, %v621_v54  ;;  %1080 = vmatpush.msk.msra.mxu3 %vm577_vm14, %v621_v54 }
 0x109   :  { %1035 = vmatpush.msk.msra.mxu0 %vm574_vm15, %v620_v49  ;;  %1081 = vmatpush.msk.msra.mxu1 %vm574_vm15, %v620_v49 }
 0x10a   :  { %1082 = vmatpush.msk.msra.mxu2 %vm574_vm15, %v620_v49  ;;  %1083 = vmatpush.msk.msra.mxu3 %vm574_vm15, %v620_v49  ;;  %v712_v5 = vpop.permute.xlu1 %711 }
 0x10b   :  { %780 = vmatmul.f32.vlgmr.msra.gmra.mxu0 %v652_v62  ;;  %792 = vmatmul.f32.vlgmr.msra.gmra.mxu1 %v656_v53 }
 0x10c   :  { %804 = vmatmul.f32.vlgmr.msra.gmra.mxu2 %v660_v27  ;;  %816 = vmatmul.f32.vlgmr.msra.gmra.mxu3 %v664_v24 }
 0x10d   :  { %v732_v25 = vpop.permute.xlu2 %731 }
 0x10e   :  { %v737_v59 = vpop.permute.xlu0 %736 }
 0x112   :  { %v727_v56 = vpop.permute.xlu1 %726 }
 0x113   :  { %783 = vmatmul.f32.gmra.mxu0 %v653_v28  ;;  %795 = vmatmul.f32.gmra.mxu1 %v657_v40 }
 0x114   :  { %807 = vmatmul.f32.gmra.mxu2 %v661_v29  ;;  %819 = vmatmul.f32.gmra.mxu3 %v665_v60 }
 0x115   :  { %v1765_v57 = vpop.permute.xlu2 %746 }
 0x116   :  { %v1767_v23 = vpop.permute.xlu0 %751 }
 0x11a   :  { %v1763_v45 = vpop.permute.xlu1 %741 }
 0x11b   :  { %786 = vmatmul.f32.gmra.mxu0 %v654_v48  ;;  %798 = vmatmul.f32.gmra.mxu1 %v658_v7 }
 0x11c   :  { %810 = vmatmul.f32.gmra.mxu2 %v662_v30  ;;  %822 = vmatmul.f32.gmra.mxu3 %v666_v37 }
 0x11d   :  { %v1771_v44 = vpop.permute.xlu2 %761 }
 0x11e   :  { %v864_v2 = vpop.permute.xlu0 %863 }
 0x122   :  { %v1769_v58 = vpop.permute.xlu1 %756 }
 0x123   :  { %789 = vmatmul.f32.gmra.mxu0 %v655_v38  ;;  %801 = vmatmul.f32.gmra.mxu1 %v659_v0 }
 0x124   :  { %813 = vmatmul.f32.gmra.mxu2 %v663_v41  ;;  %825 = vmatmul.f32.gmra.mxu3 %v667_v21 }
 0x125   :  { %v874_v6 = vpop.permute.xlu2 %873 }
 0x126   :  { %v879_v11 = vpop.permute.xlu0 %878 }
 0x12a   :  { %v869_v3 = vpop.permute.xlu1 %868 }
 0x12d   :  { %v889_v17 = vpop.permute.xlu2 %888 }
 0x12e   :  { %v894_v33 = vpop.permute.xlu0 %893 }
 0x132   :  { %v884_v36 = vpop.permute.xlu1 %883 }
 0x135   :  { %v904_v7 = vpop.permute.xlu2 %903 }
 0x136   :  { %v909_v41 = vpop.permute.xlu0 %908 }
 0x13a   :  { %v899_v28 = vpop.permute.xlu1 %898 }
 0x188   :  { %v781_v63 = vpop.f32.mrf.mxu0  ;;  %v793_v61 = vpop.f32.mrf.mxu1 }
 0x189   :  { %v782_v15 = vadd.f32 %v781_v63, %v687_v46  ;;  %v794_v51 = vadd.f32 %v793_v61, %v707_v42 }
 0x18b   :  { %v829_v10 = vmax.f32 %v782_v15, 0.0  ;;  %v833_v62 = vmax.f32 %v794_v51, 0.0  ;;  %v924_v15 = vpop.permute.xlu0 %923 }
 0x18d   :  { %v941_v20 = vmul.f32 %v864_v2, %v829_v10  ;;  %v945_v30 = vmul.f32 %v884_v36, %v833_v62 }
 0x18f   :  { %v805_v19 = vpop.f32.mrf.mxu2  ;;  %v817_v9 = vpop.f32.mrf.mxu3 }
 0x190   :  { %v784_v50 = vpop.f32.mrf.mxu0  ;;  %v796_v18 = vpop.f32.mrf.mxu1  ;;  %v806_v37 = vadd.f32 %v805_v19, %v727_v56  ;;  %v818_v19 = vadd.f32 %v817_v9, %v1765_v57 }
 0x191   :  { %v785_v1 = vadd.f32 %v784_v50, %v692_v34  ;;  %v797_v22 = vadd.f32 %v796_v18, %v712_v5  ;;  %v914_v18 = vpop.permute.xlu1 %913 }
 0x192   :  { %v837_v5 = vmax.f32 %v806_v37, 0.0 }
 0x193   :  { %v830_v16 = vmax.f32 %v785_v1, 0.0  ;;  %v834_v40 = vmax.f32 %v797_v22, 0.0  ;;  %v919_v1 = vpop.permute.xlu2 %918 }
 0x194   :  { %v949_v56 = vmul.f32 %v904_v7, %v837_v5 }
 0x195   :  { %v942_v12 = vmul.f32 %v869_v3, %v830_v16  ;;  %v946_v46 = vmul.f32 %v889_v17, %v834_v40 }
 0x197   :  { %v808_v4 = vpop.f32.mrf.mxu2  ;;  %v820_v43 = vpop.f32.mrf.mxu3  ;;  %v957_v53 = vadd.f32 %v942_v12, %v941_v20 }
 0x198   :  { %v787_v32 = vpop.f32.mrf.mxu0  ;;  %v799_v14 = vpop.f32.mrf.mxu1  ;;  %v809_v34 = vadd.f32 %v808_v4, %v732_v25  ;;  %v821_v4 = vadd.f32 %v820_v43, %v1767_v23 }
 0x199   :  { %v788_v8 = vadd.f32 %v787_v32, %v697_v47  ;;  %v800_v27 = vadd.f32 %v799_v14, %v717_v52  ;;  %v929_v12 = vpop.permute.xlu1 %928 }
 0x19a   :  { %v838_v2 = vmax.f32 %v809_v34, 0.0 }
 0x19b   :  { %v831_v39 = vmax.f32 %v788_v8, 0.0  ;;  %v835_v38 = vmax.f32 %v800_v27, 0.0  ;;  %v841_v8 = vmax.f32 %v818_v19, 0.0 }
 0x19c   :  { %v950_v25 = vmul.f32 %v909_v41, %v838_v2 }
 0x19d   :  { %v943_v35 = vmul.f32 %v874_v6, %v831_v39  ;;  %v947_v52 = vmul.f32 %v894_v33, %v835_v38  ;;  %v953_v9 = vmul.f32 %v924_v15, %v841_v8 }
 0x19f   :  { %v811_v26 = vpop.f32.mrf.mxu2  ;;  %v958_v29 = vadd.f32 %v957_v53, %v943_v35  ;;  %v823_v21 = vpop.f32.mrf.mxu3 }
 0x1a0   :  { %v790_v13 = vpop.f32.mrf.mxu0  ;;  %v802_v49 = vpop.f32.mrf.mxu1  ;;  %v812_v63 = vadd.f32 %v811_v26, %v737_v59  ;;  %v824_v16 = vadd.f32 %v823_v21, %v1769_v58 }
 0x1a1   :  { %v791_v54 = vadd.f32 %v790_v13, %v702_v31  ;;  %v803_v48 = vadd.f32 %v802_v49, %v722_v55  ;;  %v934_v13 = vpop.permute.xlu2 %933  ;;  %v939_v35 = vpop.permute.xlu0 %938 }
 0x1a2   :  { %v839_v6 = vmax.f32 %v812_v63, 0.0  ;;  %v843_v33 = vmax.f32 %v824_v16, 0.0 }
 0x1a3   :  { %v832_v24 = vmax.f32 %v791_v54, 0.0  ;;  %v836_v31 = vmax.f32 %v803_v48, 0.0 }
 0x1a4   :  { %v951_v36 = vmul.f32 %v914_v18, %v839_v6  ;;  %v955_v20 = vmul.f32 %v934_v13, %v843_v33 }
 0x1a5   :  { %v944_v60 = vmul.f32 %v879_v11, %v832_v24  ;;  %v948_v3 = vmul.f32 %v899_v28, %v836_v31  ;;  %v982_v28 = vpop.permute.xlu1 %981 }
 0x1a6   :  { %v984_v40 = vperm.slane %v982_v28, 0 }
 0x1a7   :  { %v959_v0 = vadd.f32 %v958_v29, %v944_v60  ;;  %v814_v42 = vpop.f32.mrf.mxu2  ;;  %v826_v59 = vpop.f32.mrf.mxu3 }
 0x1a8   :  { %v815_v55 = vadd.f32 %v814_v42, %v1763_v45  ;;  %v842_v45 = vmax.f32 %v821_v4, 0.0  ;;  %v827_v57 = vadd.f32 %v826_v59, %v1771_v44 }
 0x1a9   :  { %v960_v47 = vadd.f32 %v959_v0, %v945_v30 }
 0x1aa   :  { %v840_v14 = vmax.f32 %v815_v55, 0.0  ;;  %v954_v26 = vmul.f32 %v929_v12, %v842_v45  ;;  %v844_v43 = vmax.f32 %v827_v57, 0.0 }
 0x1ab   :  { %v961_v61 = vadd.f32 %v960_v47, %v946_v46 }
 0x1ac   :  { %v952_v10 = vmul.f32 %v919_v1, %v840_v14  ;;  %v956_v54 = vmul.f32 %v939_v35, %v844_v43 }
 0x1ad   :  { %v962_v50 = vadd.f32 %v961_v61, %v947_v52 }
 0x1af   :  { %v963_v11 = vadd.f32 %v962_v50, %v948_v3 }
 0x1b1   :  { %v964_v32 = vadd.f32 %v963_v11, %v949_v56 }
 0x1b3   :  { %v965_v17 = vadd.f32 %v964_v32, %v950_v25 }
 0x1b5   :  { %v966_v39 = vadd.f32 %v965_v17, %v951_v36 }
 0x1b7   :  { %v967_v51 = vadd.f32 %v966_v39, %v952_v10 }
 0x1b9   :  { %v968_v23 = vadd.f32 %v967_v51, %v953_v9 }
 0x1bb   :  { %v969_v22 = vadd.f32 %v968_v23, %v954_v26 }
 0x1bd   :  { %v970_v49 = vadd.f32 %v969_v22, %v955_v20 }
 0x1bf   :  { %v971_v58 = vadd.f32 %v970_v49, %v956_v54 }
 0x1c1   :  { %v972_v62 = vrot.slane %v971_v58, 4 }
 0x1c3   :  { %v973_v53 = vadd.f32 %v972_v62, %v971_v58 }
 0x1c5   :  { %v974_v27 = vrot.slane %v973_v53, 2 }
 0x1c7   :  { %v975_v24 = vadd.f32 %v974_v27, %v973_v53 }
 0x1c9   :  { %v976_v44 = vrot.slane %v975_v24, 1 }
 0x1cb   :  { %v977_v29 = vadd.f32 %v976_v44, %v975_v24 }
 0x1cd   :  { %v985_v60 = vadd.f32 %v984_v40, %v977_v29 }
 0x1cf   :  { %v986_v48 = vand.u32 2147483647, %v985_v60 }
 0x1d1   :  { %987 = vst [vmem:[#allocation5] sm:$0x1] %v986_v48 }
 0x1d2   :  { %998 = dma.vmem_to_hbm [thread:$0]  %s994_s12, 16, %s996_s15, [#allocation6]  }
 0x1d3   :  { %1119 = dma.done.wait [#allocation6], 16  }
 0x1d4   :  { %1120 = vsyncadd [#allocation6], 4294967280 }
 0x1d5   :  { %1003 = vsyncpa [#allocation6], 1 }

</bundles_post_ra>
